<compile_context>
chip_gen: v6e
topology: v6e:2x2x1
jax: 0.10.0
libtpu: 0.0.40
codegen_flags: <defaults>
</compile_context>

<pallas_src>
import jax
import jax.numpy as jnp
from jax.experimental import pallas as pl
from jax.experimental.pallas import tpu as pltpu  # noqa: F401  (not needed at this size)


def _attention_kernel(x_ref, w_ref, bw_ref, out_ref):
    # x_ref  : (L*B, 2E+D)  rows in native seq-major (l, b) order, [enc | hid]
    # w_ref  : (2E+D, D)    merged [W_e ; W_h]
    # bw_ref : (2, D)       row 0 = attention bias, row 1 = revise weight
    # out_ref: (B, L)
    B, L = out_ref.shape

    bias = bw_ref[0:1, :]                                            # (1, D)
    wr = bw_ref[1:2, :]                                              # (1, D)

    # (1) ONE MXU matmul for the whole (word_len x batch) problem.
    att = jnp.dot(x_ref[...], w_ref[...],
                  preferred_element_type=jnp.float32) + bias         # (L*B, D)

    # (2) Vectorized epilogue: one tanh, one multiply, one lane reduce.
    energy = jnp.tanh(att)                                           # (L*B, D)
    scores_col = jnp.sum(energy * wr, axis=-1, keepdims=True)        # (L*B, 1)

    # (3) Rearrange the (l, b)-ordered score column into a (B, L) register
    #     tile: static sublane slices + one lane concat, no VMEM staging.
    scores = jnp.concatenate(
        [scores_col[l * B:(l + 1) * B, :] for l in range(L)], axis=1)  # (B, L)

    # (4) Max-stabilized softmax over word_len (lane axis), single store.
    m = jnp.max(scores, axis=-1, keepdims=True)
    p = jnp.exp(scores - m)
    denom = jnp.sum(p, axis=-1, keepdims=True)
    out_ref[...] = p * pl.reciprocal(denom, approx=False)


@jax.jit
def attention_forward(encoder_output, hidden, W_att, b_att, W_rev):
    """encoder_output: [L, B, 2E], hidden: [B, D],
    W_att: [D, D+2E], b_att: [D], W_rev: [1, D]  ->  [B, L]."""
    L, B, E2 = encoder_output.shape
    D = hidden.shape[1]

    # Weight prep (tiny, folded under this jit).
    #   cat((hid, enc)) @ W_att.T  ==  enc @ W_e + hid @ W_h,
    # so feed [enc | hid] against the merged weight [W_e ; W_h].
    W_T = jnp.transpose(W_att).astype(jnp.float32)                   # (D+2E, D)
    W_cat = jnp.concatenate([W_T[D:, :], W_T[:D, :]], axis=0)        # (2E+D, D)
    bw = jnp.stack([b_att.astype(jnp.float32),
                    W_rev.reshape(D).astype(jnp.float32)], axis=0)   # (2, D)

    # Activations: free (layout-preserving) reshape of the seq-major encoder
    # tensor, plus a sublane-tiled copy of hidden, concatenated along lanes.
    enc_flat = encoder_output.reshape(L * B, E2).astype(jnp.float32)  # (L*B, 2E)
    hid_tiled = jnp.tile(hidden.astype(jnp.float32), (L, 1))          # (L*B, D)
    x_cat = jnp.concatenate([enc_flat, hid_tiled], axis=1)            # (L*B, 2E+D)

    # Single invocation, no grid: every operand (a few KB) is mapped whole
    # into VMEM by the default BlockSpecs.
    out = pl.pallas_call(
        _attention_kernel,
        out_shape=jax.ShapeDtypeStruct((B, L), jnp.float32),
    )(x_cat, W_cat, bw)
    return out


def _reference(encoder_output, hidden, W_att, b_att, W_rev):
    """Pure-JAX mirror of the PyTorch forward, for correctness checking."""
    L = encoder_output.shape[0]
    hid_rep = jnp.repeat(hidden[:, None, :], L, axis=1)              # [B, L, D]
    enc_perm = jnp.transpose(encoder_output, (1, 0, 2))              # [B, L, 2E]
    x = jnp.concatenate((hid_rep, enc_perm), axis=2)                 # [B, L, D+2E]
    att = jnp.tanh(x @ W_att.T + b_att)                              # [B, L, D]
    scores = (att @ W_rev.T)[..., 0]                                 # [B, L]
    return jax.nn.softmax(scores, axis=1)


if __name__ == "__main__":
    ENC_HIDDEN = 16
    DEC_HIDDEN = 32
    WORD_LEN = 8
    BATCH = 2

    key = jax.random.PRNGKey(0)
    k1, k2, k3, k4, k5 = jax.random.split(key, 5)

    # deterministic synthetic parameters (shapes match nn.Linear weight layouts)
    W_att = jax.random.normal(k1, (DEC_HIDDEN, ENC_HIDDEN * 2 + DEC_HIDDEN), jnp.float32) * 0.1
    b_att = jax.random.normal(k2, (DEC_HIDDEN,), jnp.float32) * 0.1
    W_rev = jax.random.normal(k3, (1, DEC_HIDDEN), jnp.float32) * 0.1

    # inputs in PyTorch layout
    encoder_output = jax.random.normal(k4, (WORD_LEN, BATCH, ENC_HIDDEN * 2), jnp.float32)
    hidden = jax.random.normal(k5, (BATCH, DEC_HIDDEN), jnp.float32)

    out = attention_forward(encoder_output, hidden, W_att, b_att, W_rev)
    jax.block_until_ready(out)

    ref = _reference(encoder_output, hidden, W_att, b_att, W_rev)
    assert out.shape == (BATCH, WORD_LEN)
    assert jnp.allclose(out, ref, atol=1e-5, rtol=1e-5), "mismatch vs reference"
    assert jnp.allclose(jnp.sum(out, axis=1), 1.0, atol=1e-5), "softmax rows must sum to 1"

    print("KERNEL_OK")
</pallas_src>

<mosaic_0001>
module attributes {stable_mosaic.version = 11 : i64} {
  func.func @_attention_kernel(%arg0: memref<16x64xf32, #tpu.memory_space<vmem>>, %arg1: memref<64x32xf32, #tpu.memory_space<vmem>>, %arg2: memref<2x32xf32, #tpu.memory_space<vmem>>, %arg3: memref<2x8xf32, #tpu.memory_space<vmem>>) attributes {dimension_semantics = [], scalar_prefetch = 0 : i64, scratch_operands = 0 : i64, tpu.core_type = #tpu.core_type<tc>} {
    %c0 = arith.constant 0 : index
    %c0_0 = arith.constant 0 : index
    %0 = vector.load %arg2[%c0, %c0_0] : memref<2x32xf32, #tpu.memory_space<vmem>>, vector<1x32xf32>
    %c1 = arith.constant 1 : index
    %c0_1 = arith.constant 0 : index
    %1 = vector.load %arg2[%c1, %c0_1] : memref<2x32xf32, #tpu.memory_space<vmem>>, vector<1x32xf32>
    %c0_2 = arith.constant 0 : index
    %c0_3 = arith.constant 0 : index
    %2 = vector.load %arg0[%c0_2, %c0_3] : memref<16x64xf32, #tpu.memory_space<vmem>>, vector<16x64xf32>
    %c0_4 = arith.constant 0 : index
    %c0_5 = arith.constant 0 : index
    %3 = vector.load %arg1[%c0_4, %c0_5] : memref<64x32xf32, #tpu.memory_space<vmem>>, vector<64x32xf32>
    %cst = arith.constant dense<0.000000e+00> : vector<16x32xf32>
    %4 = tpu.matmul %2, %3, %cst {dimension_numbers = #tpu.dot_dimension_numbers<[1], [0], [0], [1], [0, 0, 1, 1], [], []>} : vector<16x64xf32>, vector<64x32xf32>, vector<16x32xf32> -> vector<16x32xf32>
    %5 = vector.broadcast %0 : vector<1x32xf32> to vector<16x32xf32>
    %6 = arith.addf %4, %5 : vector<16x32xf32>
    %7 = math.tanh %6 : vector<16x32xf32>
    %8 = vector.broadcast %1 : vector<1x32xf32> to vector<16x32xf32>
    %9 = arith.mulf %7, %8 : vector<16x32xf32>
    %cst_6 = arith.constant dense<0.000000e+00> : vector<16xf32>
    %10 = vector.multi_reduction <add>, %9, %cst_6 [1] : vector<16x32xf32> to vector<16xf32>
    %11 = vector.shape_cast %10 : vector<16xf32> to vector<16x1xf32>
    %12 = vector.extract_strided_slice %11 {offsets = [0, 0], sizes = [2, 1], strides = [1, 1]} : vector<16x1xf32> to vector<2x1xf32>
    %13 = vector.extract_strided_slice %11 {offsets = [2, 0], sizes = [2, 1], strides = [1, 1]} : vector<16x1xf32> to vector<2x1xf32>
    %14 = vector.extract_strided_slice %11 {offsets = [4, 0], sizes = [2, 1], strides = [1, 1]} : vector<16x1xf32> to vector<2x1xf32>
    %15 = vector.extract_strided_slice %11 {offsets = [6, 0], sizes = [2, 1], strides = [1, 1]} : vector<16x1xf32> to vector<2x1xf32>
    %16 = vector.extract_strided_slice %11 {offsets = [8, 0], sizes = [2, 1], strides = [1, 1]} : vector<16x1xf32> to vector<2x1xf32>
    %17 = vector.extract_strided_slice %11 {offsets = [10, 0], sizes = [2, 1], strides = [1, 1]} : vector<16x1xf32> to vector<2x1xf32>
    %18 = vector.extract_strided_slice %11 {offsets = [12, 0], sizes = [2, 1], strides = [1, 1]} : vector<16x1xf32> to vector<2x1xf32>
    %19 = vector.extract_strided_slice %11 {offsets = [14, 0], sizes = [2, 1], strides = [1, 1]} : vector<16x1xf32> to vector<2x1xf32>
    %20 = tpu.concatenate %12, %13, %14, %15, %16, %17, %18, %19 in 1 : vector<2x1xf32>, vector<2x1xf32>, vector<2x1xf32>, vector<2x1xf32>, vector<2x1xf32>, vector<2x1xf32>, vector<2x1xf32>, vector<2x1xf32> -> vector<2x8xf32>
    %cst_7 = arith.constant dense<0xFF800000> : vector<2xf32>
    %21 = vector.multi_reduction <maximumf>, %20, %cst_7 [1] : vector<2x8xf32> to vector<2xf32>
    %22 = vector.shape_cast %21 : vector<2xf32> to vector<2x1xf32>
    %23 = vector.broadcast %22 : vector<2x1xf32> to vector<2x8xf32>
    %24 = arith.subf %20, %23 : vector<2x8xf32>
    %25 = math.exp %24 : vector<2x8xf32>
    %cst_8 = arith.constant dense<0.000000e+00> : vector<2xf32>
    %26 = vector.multi_reduction <add>, %25, %cst_8 [1] : vector<2x8xf32> to vector<2xf32>
    %27 = vector.shape_cast %26 : vector<2xf32> to vector<2x1xf32>
    %28 = tpu.reciprocal %27 : vector<2x1xf32> -> vector<2x1xf32>
    %29 = vector.broadcast %28 : vector<2x1xf32> to vector<2x8xf32>
    %30 = arith.mulf %25, %29 : vector<2x8xf32>
    %c0_9 = arith.constant 0 : index
    %c0_10 = arith.constant 0 : index
    %31 = vector.load %arg3[%c0_9, %c0_10] : memref<2x8xf32, #tpu.memory_space<vmem>>, vector<2x8xf32>
    tpu.vector_store %arg3[%c0_9, %c0_10], %30 {strides = array<i32>} : memref<2x8xf32, #tpu.memory_space<vmem>>, vector<2x8xf32>,
    return
  }
}

</mosaic_0001>

<bundles_post_ra>
// kernel: attention_forward.1
= control target key start
LH: loop header
LB: loop body
LE: loop exit
PB: predicated region body
PF: predicated region fallthrough
CT: control target
= control target key end

     0   :  { %vm31_vm0 = vcmask 523264   ;;  %s312_s0 = inlined_call_operand.vmem [shape: f32[16,64], index: 0, kind: input, shape index: {}]   ;;  %s313_s1 = inlined_call_operand.vmem [shape: f32[64,32], index: 1, kind: input, shape index: {}]   ;;  %s314_s2 = inlined_call_operand.vmem [shape: f32[2,32], index: 2, kind: input, shape index: {}]   ;;  %s315_s3 = inlined_call_operand.hbm [shape: f32[2,8], index: 3, kind: output, shape index: {}]  }
   0x1   :  { %v26_v0 = vld [vmem:[%s313_s1 + $0x38] sm:$0xff]  ;;  %v25_v1 = vld [vmem:[%s313_s1 + $0x30] sm:$0xff]  ;;  %v24_v2 = vld [vmem:[%s313_s1 + $0x28] sm:$0xff] }
   0x2   :  { %197 = vmatprep.subr.mxu0 %v26_v0  ;;  %v17_v3 = vld [vmem:[%s312_s0] sm:$0xff] }
   0x3   :  { %198 = vmatpush3.msra.mxu0 %v26_v0  ;;  %213 = vmatprep.mubr.msk.f32.mxu0 %vm31_vm0, %v17_v3 }
   0x4   :  { %199 = vmatprep.subr.mxu0 %v25_v1 }
   0x5   :  { %8 = vsyncpa [#allocation3], 0  ;;  %200 = vmatpush3.msra.mxu0 %v25_v1  ;;  %v23_v4 = vld [vmem:[%s313_s1 + $0x20] sm:$0xff]  ;;  %v22_v5 = vld [vmem:[%s313_s1 + $0x18] sm:$0xff]  ;;  %vm121_vm1 = vcmask 261120   ;;  %vm142_vm2 = vcmask 7168  }
   0x6   :  { %201 = vmatprep.subr.mxu0 %v24_v2  ;;  %v21_v6 = vld [vmem:[%s313_s1 + $0x10] sm:$0xff]  ;;  %v20_v7 = vld [vmem:[%s313_s1 + $0x8] sm:$0xff]  ;;  %v19_v8 = vld [vmem:[%s313_s1] sm:$0xff]  ;;  %vm144_vm3 = vcmask 15360   ;;  %vm146_vm4 = vcmask 23552   ;;  %vm148_vm5 = vcmask 31744  }
   0x7   :  { %202 = vmatpush3.msra.mxu0 %v24_v2  ;;  %v18_v9 = vld [vmem:[%s312_s0 + $0x8] sm:$0xff]  ;;  %v183_v10 = vld [vmem:[%s314_s2] ss:$0 sm:$0xff]  ;;  %v186_v17 = vld [vmem:[%s314_s2 + $0x1] ss:$0 sm:$0xff]  ;;  %vm150_vm6 = vcmask 39936  }
   0x8   :  { %203 = vmatprep.subr.mxu0 %v23_v4  ;;  %vm152_vm7 = vcmask 48128   ;;  %vm154_vm8 = vcmask 56320   ;;  %vm156_vm9 = vcmask 58368   ;;  %s247_s0 = smov [#allocation2]  }
   0x9   :  { %204 = vmatpush3.msra.mxu0 %v23_v4  ;;  %s175_s2 = sshll.u32 %s247_s0, 4  ;;  %s176_s2 = int_to_ptr.vmem [resolvable:$true] %s175_s2 }
   0xa   :  { %205 = vmatprep.subr.mxu0 %v22_v5  ;;  %s225_s8 = scalar_lea.vmem %s176_s2, 32  ;;  %p230_p1 = scmp.lt.s32.totalorder %s176_s2, %s176_s2 }
   0xb   :  { %206 = vmatpush3.msra.mxu0 %v22_v5  ;;  %p226_p0 = scmp.ne.s32.totalorder %s176_s2, %s225_s8  ;;  %p231_p2 = scmp.lt.s32.totalorder %s225_s8, %s225_s8 }
   0xc   :  { %207 = vmatprep.subr.mxu0 %v21_v6 }
   0xd   :  { %208 = vmatpush3.msra.mxu0 %v21_v6  ;;  %p232_p3 = por %p231_p2, %p230_p1 }
   0xe   :  { %209 = vmatprep.subr.mxu0 %v20_v7 }
   0xf   :  { %210 = vmatpush3.msra.mxu0 %v20_v7  ;;  %p233_p4 = pnand %p232_p3, %p226_p0 }
  0x10   :  { %211 = vmatprep.subr.mxu0 %v19_v8 }
  0x11   :  { %212 = vmatpush3.msra.mxu0 %v19_v8 }
  0x12   :  { %214 = vmatmul.mubr.msk.f32.vlgmr.msra.gmra.mxu0 %vm31_vm0, %v18_v9 }
  0xd2   :  { %v215_v11 = vpop.f32.mrf.mxu0 }
  0xd3   :  { %v110_v12 = vadd.f32 %v215_v11, %v183_v10 }
  0xd4   :  { %v104_v13 = vpop.f32.mrf.mxu0 }
  0xd5   :  { %v105_v14 = vadd.f32 %v183_v10, %v104_v13  ;;  %217 = vtanh.f32 %v110_v12 }
  0xd7   :  { %219 = vtanh.f32 %v105_v14 }
  0xe2   :  { %v218_v15 = vpop.eup %217 }
  0xe3   :  { %v120_v20 = vmul.f32 %v218_v15, %v186_v17 }
  0xe4   :  { %v220_v16 = vpop.eup %219 }
  0xe5   :  { %v119_v18 = vmul.f32 %v220_v16, %v186_v17  ;;  %v125_v21 = vsel %vm121_vm1, %v120_v20, 0.0 }
  0xe7   :  { %v122_v19 = vsel %vm121_vm1, %v119_v18, 0.0 }
  0xe8   :  { %123 = vadd.xlane.f32.xlu0 %v122_v19 }
  0xec   :  { %126 = vadd.xlane.f32.xlu0 %v125_v21 }
 0x171   :  { %v124_v22 = vpop.xlane.xlu0 %123 }
 0x172   :  { %v129_v23 = vrot.slane %v124_v22, 2  ;;  %v131_v24 = vrot.slane %v124_v22, 4  ;;  %v133_v25 = vrot.slane %v124_v22, 6 }
 0x174   :  { %v143_v26 = vsel %vm142_vm2, %v124_v22, %v129_v23 }
 0x175   :  { %v145_v27 = vsel %vm144_vm3, %v143_v26, %v131_v24  ;;  %v127_v28 = vpop.xlane.xlu0 %126 }
 0x176   :  { %v147_v29 = vsel %vm146_vm4, %v145_v27, %v133_v25  ;;  %v136_v30 = vrot.slane %v127_v28, 2  ;;  %v138_v31 = vrot.slane %v127_v28, 4  ;;  %v140_v33 = vrot.slane %v127_v28, 6 }
 0x177   :  { %v149_v32 = vsel %vm148_vm5, %v147_v29, %v127_v28 }
 0x178   :  { %v151_v34 = vsel %vm150_vm6, %v149_v32, %v136_v30 }
 0x179   :  { %v153_v35 = vsel %vm152_vm7, %v151_v34, %v138_v31 }
 0x17a   :  { %v155_v36 = vsel %vm154_vm8, %v153_v35, %v140_v33 }
 0x17b   :  { %v157_v37 = vsel %vm156_vm9, %v155_v36, -inf }
 0x17c   :  { %158 = vmax.xlane.f32.xlu1 %v157_v37 }
 0x205   :  { %v159_v38 = vpop.xlane.xlu1 %158 }
 0x206   :  { %v160_v39 = vsub.f32 %v155_v36, %v159_v38 }
 0x208   :  { %v161_v40 = vmul.f32 1.442695, %v160_v39 }
 0x20a   :  { %221 = vpow2.f32 %v161_v40 }
 0x217   :  { %v222_v41 = vpop.eup %221 }
 0x218   :  { %v163_v42 = vsel %vm156_vm9, %v222_v41, 0.0 }
 0x219   :  { %164 = vadd.xlane.f32.xlu1 %v163_v42 }
 0x2a2   :  { %v165_v43 = vpop.xlane.xlu1 %164 }
 0x2a3   :  { %223 = vrcp.f32 %v165_v43 }
 0x2b0   :  { %v224_v44 = vpop.eup %223 }
 0x2b1   :  { %v167_v45 = vmul.f32 %v224_v44, %v222_v41 }
 0x2b3   :  { %168 = vst.msk [vmem:[#allocation2] sm:$0x3] %vm156_vm9, %v167_v45 }
 0x2b4   :  { %236 = shalt.err (!%p233_p4)
}
 0x2b5   :  { %178 = dma.vmem_to_hbm [thread:$0]  %s176_s2, 32, %s315_s3, [#allocation3]  }
 0x2b6   :  { %245 = dma.done.wait [#allocation3], 32  }
 0x2b7   :  { %246 = vsyncadd [#allocation3], 4294967264 }
 0x2b8   :  { %182 = vsyncpa [#allocation3], 1 }

</bundles_post_ra>
